<compile_context>
chip_gen: v5e
topology: v5e:2x2
jax: 0.10.0
libtpu: 0.0.40
codegen_flags: <defaults>
</compile_context>

<pallas_src>
import functools

import jax
import jax.numpy as jnp
from jax.experimental import pallas as pl
from jax.experimental.pallas import tpu as pltpu


def _round_up(x, m):
    return (x + m - 1) // m * m


def _pad_multiple(dim, lane_multiple=None):
    # v6e/v7x MXUs are 256x256: once a feature dim exceeds one 128-lane tile, pad the
    # K/N dims to 256 so compute-bound layers can fill the wide MXU.  Dims <= 128 stay
    # at 128 (saturates v5e's 128x128 MXU, avoids doubling padding waste at toy sizes).
    if lane_multiple is not None:
        return lane_multiple
    return 128 if dim <= 128 else 256


def _vmem_capacity_bytes():
    # Generation-aware VMEM capacity (v5e/v6e: 128 MiB, v7x: 64 MiB per TC).
    try:
        cap = getattr(pltpu.get_tpu_info(), "vmem_capacity_bytes", None)
        if cap:
            return int(cap)
    except Exception:
        pass
    return 64 << 20  # conservative fallback = v7x per-TC VMEM


def prepare_params(params, compute_dtype=jnp.bfloat16, lane_multiple=None):
    """One-time weight prep (hoisted out of the hot path).

    params: list of (W, b) in PyTorch layout, W: (out_features, in_features).
    Returns list of (Wt_padded (in_p, out_p) in compute_dtype, b_padded (1, out_p) f32)
    with feature dims zero-padded to lane-dense multiples (128, or 256 for dims > 128).
    """
    prepped = []
    for (w, b) in params:
        w = jnp.asarray(w)
        b = jnp.asarray(b)
        out_f, in_f = w.shape
        in_p = _round_up(in_f, _pad_multiple(in_f, lane_multiple))
        out_p = _round_up(out_f, _pad_multiple(out_f, lane_multiple))
        wt = jnp.zeros((in_p, out_p), compute_dtype).at[:in_f, :out_f].set(
            w.T.astype(compute_dtype))
        bp = jnp.zeros((1, out_p), jnp.float32).at[0, :out_f].set(
            b.astype(jnp.float32))
        prepped.append((wt, bp))
    return prepped


def _make_kernel(n_layers, in_f, in_p, compute_dtype, activate_output):
    needs_pad = in_p > in_f

    def kernel(x_ref, *refs):
        if needs_pad:
            xs_ref = refs[-1]
            refs = refs[:-1]
        o_ref = refs[-1]
        wb = refs[:-1]

        if needs_pad:
            # Zero the padded-K scratch once (tail columns stay zero across the whole
            # grid since the scratch persists), then overwrite the live columns with
            # the cast input tile each step.
            @pl.when(pl.program_id(0) == 0)
            def _():
                xs_ref[...] = jnp.zeros_like(xs_ref)

            xs_ref[:, :in_f] = x_ref[...].astype(compute_dtype)
            h = xs_ref[...]
        else:
            h = x_ref[...].astype(compute_dtype)

        for li in range(n_layers):
            w_ref = wb[2 * li]
            b_ref = wb[2 * li + 1]
            # f32 accumulation on the MXU; bias + ReLU in f32, requantize to bf16 for
            # the next layer's MXU inputs.
            h32 = jnp.dot(h, w_ref[...], preferred_element_type=jnp.float32)
            h32 = h32 + b_ref[...]
            last = li == n_layers - 1
            if (not last) or activate_output:
                h32 = jnp.maximum(h32, 0.0)
            h = h32 if last else h32.astype(compute_dtype)

        o_ref[...] = h.astype(o_ref.dtype)

    return kernel


@functools.partial(
    jax.jit,
    static_argnames=("out_features", "batch_tile", "activate_output", "return_padded"))
def mlp_forward(x, prepped, out_features, *, batch_tile=None,
                activate_output=False, return_padded=False):
    """x: (B, in_features).  prepped: output of prepare_params()."""
    B, in_f = x.shape
    n_layers = len(prepped)
    compute_dtype = prepped[0][0].dtype
    c_itemsize = jnp.dtype(compute_dtype).itemsize
    x_itemsize = jnp.dtype(x.dtype).itemsize
    in_p = prepped[0][0].shape[0]
    out_p = prepped[-1][0].shape[1]
    hid_p = max(wt.shape[1] for wt, _ in prepped)
    assert in_f <= in_p, "x feature dim exceeds prepared weight input dim"

    # Sublane multiple of the compute dtype (bf16 packs 2 rows/sublane -> 16).
    sub = 8 * max(1, 4 // c_itemsize)

    if batch_tile is None:
        bt = min(1024, _round_up(B, sub))
        steps = pl.cdiv(B, bt)
        # v7x megacore: prefer >=2 (and even) grid steps when the batch is large
        # enough to split into >=2 sublane-aligned tiles.
        if steps == 1 and B > sub:
            steps = 2
        if steps > 1 and steps % 2 == 1:
            steps += 1
        bt = _round_up(pl.cdiv(B, steps), sub)
    else:
        bt = _round_up(int(batch_tile), sub)

    needs_pad = in_p > in_f

    # Generation-aware VMEM accounting: count the resident weights at 2x (default
    # pipelining double-buffers even constant-index-map blocks) and shrink the batch
    # tile until the estimate fits, rather than just clamping vmem_limit_bytes.
    w_bytes = sum(wt.size * c_itemsize + bp.size * 4 for wt, bp in prepped)
    w_resident = 2 * w_bytes

    def _tile_bytes(t):
        b = 2 * t * in_f * x_itemsize          # double-buffered x tiles (streamed)
        b += 2 * t * out_p * c_itemsize        # double-buffered out tiles
        if needs_pad:
            b += t * in_p * c_itemsize         # padded-K input scratch
        b += 3 * t * hid_p * 4                 # f32 intermediates headroom
        return b

    vmem_cap = _vmem_capacity_bytes()
    budget = int(vmem_cap * 0.85)
    while bt > sub and w_resident + _tile_bytes(bt) > budget:
        bt = max(sub, _round_up(bt // 2, sub))

    Bp = _round_up(B, bt)
    grid = (Bp // bt,)

    # Only the batch dim is padded in the wrapper (no feature pad / dtype cast pass).
    if Bp != B:
        x = jnp.pad(x, ((0, Bp - B), (0, 0)))

    flat = []
    in_specs = [pl.BlockSpec((bt, in_f), lambda i: (i, 0))]
    for (wt, bp) in prepped:
        flat += [wt, bp]
        in_specs += [
            pl.BlockSpec(wt.shape, lambda i: (0, 0)),   # VMEM-resident across grid
            pl.BlockSpec(bp.shape, lambda i: (0, 0)),
        ]

    scratch_shapes = [pltpu.VMEM((bt, in_p), compute_dtype)] if needs_pad else []

    need = int(w_resident + _tile_bytes(bt) + (4 << 20))
    vmem_limit = int(min(max(need, 16 << 20), max(vmem_cap - (2 << 20), 16 << 20)))

    flops = sum(2 * Bp * wt.shape[0] * wt.shape[1] for wt, _ in prepped)
    bytes_accessed = (Bp * in_f * x_itemsize + w_bytes + Bp * out_p * c_itemsize)
    cost = pl.CostEstimate(flops=flops, transcendentals=0,
                           bytes_accessed=bytes_accessed)

    kernel = _make_kernel(n_layers, in_f, in_p, compute_dtype, activate_output)

    out = pl.pallas_call(
        kernel,
        out_shape=jax.ShapeDtypeStruct((Bp, out_p), compute_dtype),
        grid_spec=pltpu.PrefetchScalarGridSpec(
            num_scalar_prefetch=0,
            grid=grid,
            in_specs=in_specs,
            out_specs=pl.BlockSpec((bt, out_p), lambda i: (i, 0)),
            scratch_shapes=scratch_shapes,
        ),
        compiler_params=pltpu.CompilerParams(
            dimension_semantics=("parallel",),
            vmem_limit_bytes=vmem_limit),
        cost_estimate=cost,
    )(x, *flat)

    if return_padded:
        return out  # (Bp, out_p) slab in compute dtype; caller slices/casts as needed
    return out[:B, :out_features].astype(x.dtype)


def _init_linear(key, out_f, in_f, dtype=jnp.float32):
    # Deterministic synthetic init (uniform, PyTorch-like fan_in scaling).
    kw, kb = jax.random.split(key)
    bound = 1.0 / jnp.sqrt(jnp.asarray(in_f, dtype))
    w = jax.random.uniform(kw, (out_f, in_f), dtype, -bound, bound)
    b = jax.random.uniform(kb, (out_f,), dtype, -bound, bound)
    return w, b


if __name__ == "__main__":
    in_features, hidden_features, out_features = 16, 32, 8
    num_blocks = 2
    batch = 8

    key = jax.random.PRNGKey(0)
    keys = jax.random.split(key, num_blocks + 3)

    params = []
    params.append(_init_linear(keys[0], hidden_features, in_features))      # initial_layer
    for i in range(num_blocks):
        params.append(_init_linear(keys[1 + i], hidden_features, hidden_features))
    params.append(_init_linear(keys[num_blocks + 1], out_features, hidden_features))

    x = jax.random.normal(keys[-1], (batch, in_features), jnp.float32)

    # One-time weight prep (transpose + pad + bf16 cast) hoisted out of the forward.
    prepped = prepare_params(params, compute_dtype=jnp.bfloat16)

    y = mlp_forward(x, prepped, out_features)
    y = jax.block_until_ready(y)
    assert y.shape == (batch, out_features)
    assert y.dtype == x.dtype

    # Reference 1: same arithmetic (bf16 inputs/weights/activations, f32 accumulation,
    # bf16 writeback) in pure JAX.
    cdt = prepped[0][0].dtype
    h = jnp.zeros((batch, prepped[0][0].shape[0]), cdt).at[:, :in_features].set(
        x.astype(cdt))
    for li, (wt, bp) in enumerate(prepped):
        h32 = jnp.dot(h, wt, preferred_element_type=jnp.float32) + bp
        h = jnp.maximum(h32, 0.0).astype(cdt) if li < len(prepped) - 1 else h32
    ref_bf16 = h[:, :out_features].astype(cdt).astype(jnp.float32)
    assert jnp.allclose(y, ref_bf16, atol=1e-3, rtol=1e-2), "mismatch vs bf16-path ref"

    # Reference 2: full-precision PyTorch-style forward (loose tol due to bf16 path).
    ref = x
    for li, (w, b) in enumerate(params):
        ref = ref @ w.T + b
        if li < len(params) - 1:
            ref = jnp.maximum(ref, 0.0)
    assert jnp.allclose(y, ref, atol=5e-2, rtol=5e-2), "mismatch vs f32 reference"

    print("KERNEL_OK")
</pallas_src>

<mosaic_0001>
module attributes {stable_mosaic.version = 11 : i64} {
  func.func @kernel(%arg0: i32, %arg1: memref<16x16xf32, #tpu.memory_space<vmem>>, %arg2: memref<128x128xbf16, #tpu.memory_space<vmem>>, %arg3: memref<1x128xf32, #tpu.memory_space<vmem>>, %arg4: memref<128x128xbf16, #tpu.memory_space<vmem>>, %arg5: memref<1x128xf32, #tpu.memory_space<vmem>>, %arg6: memref<128x128xbf16, #tpu.memory_space<vmem>>, %arg7: memref<1x128xf32, #tpu.memory_space<vmem>>, %arg8: memref<128x128xbf16, #tpu.memory_space<vmem>>, %arg9: memref<1x128xf32, #tpu.memory_space<vmem>>, %arg10: memref<16x128xbf16, #tpu.memory_space<vmem>>, %arg11: memref<16x128xbf16, #tpu.memory_space<vmem>>) attributes {dimension_semantics = [#tpu.dimension_semantics<parallel>], iteration_bounds = array<i64: 1>, scalar_prefetch = 0 : i64, scratch_operands = 1 : i64, tpu.core_type = #tpu.core_type<tc>, window_params = [{transform_indices = @transform_0, window_bounds = array<i64: 16, 16>}, {pipeline_mode = #tpu.pipeline_mode<synchronous>, transform_indices = @transform_1, window_bounds = array<i64: 128, 128>}, {pipeline_mode = #tpu.pipeline_mode<synchronous>, transform_indices = @transform_2, window_bounds = array<i64: 1, 128>}, {pipeline_mode = #tpu.pipeline_mode<synchronous>, transform_indices = @transform_3, window_bounds = array<i64: 128, 128>}, {pipeline_mode = #tpu.pipeline_mode<synchronous>, transform_indices = @transform_4, window_bounds = array<i64: 1, 128>}, {pipeline_mode = #tpu.pipeline_mode<synchronous>, transform_indices = @transform_5, window_bounds = array<i64: 128, 128>}, {pipeline_mode = #tpu.pipeline_mode<synchronous>, transform_indices = @transform_6, window_bounds = array<i64: 1, 128>}, {pipeline_mode = #tpu.pipeline_mode<synchronous>, transform_indices = @transform_7, window_bounds = array<i64: 128, 128>}, {pipeline_mode = #tpu.pipeline_mode<synchronous>, transform_indices = @transform_8, window_bounds = array<i64: 1, 128>}, {transform_indices = @transform_9, window_bounds = array<i64: 16, 128>}]} {
    %c0_i32 = arith.constant 0 : i32
    %0 = arith.cmpi eq, %arg0, %c0_i32 : i32
    %1 = arith.extui %0 : i1 to i32
    %c0_i32_0 = arith.constant 0 : i32
    %2 = arith.cmpi ne, %1, %c0_i32_0 : i32
    scf.if %2 {
      %cst_30 = arith.constant 0.000000e+00 : bf16
      %38 = vector.broadcast %cst_30 : bf16 to vector<16x128xbf16>
      %c0_31 = arith.constant 0 : index
      %c0_32 = arith.constant 0 : index
      %39 = vector.load %arg11[%c0_31, %c0_32] : memref<16x128xbf16, #tpu.memory_space<vmem>>, vector<16x128xbf16>
      tpu.vector_store %arg11[%c0_31, %c0_32], %38 {strides = array<i32>} : memref<16x128xbf16, #tpu.memory_space<vmem>>, vector<16x128xbf16>,
    } else {
    }
    %c0 = arith.constant 0 : index
    %c0_1 = arith.constant 0 : index
    %3 = vector.load %arg1[%c0, %c0_1] : memref<16x16xf32, #tpu.memory_space<vmem>>, vector<16x16xf32>
    %4 = arith.truncf %3 : vector<16x16xf32> to vector<16x16xbf16>
    %c0_2 = arith.constant 0 : index
    %c0_3 = arith.constant 0 : index
    %5 = vector.load %arg11[%c0_2, %c0_3] : memref<16x128xbf16, #tpu.memory_space<vmem>>, vector<16x16xbf16>
    tpu.vector_store %arg11[%c0_2, %c0_3], %4 {strides = array<i32>} : memref<16x128xbf16, #tpu.memory_space<vmem>>, vector<16x16xbf16>,
    %c0_4 = arith.constant 0 : index
    %c0_5 = arith.constant 0 : index
    %6 = vector.load %arg11[%c0_4, %c0_5] : memref<16x128xbf16, #tpu.memory_space<vmem>>, vector<16x128xbf16>
    %c0_6 = arith.constant 0 : index
    %c0_7 = arith.constant 0 : index
    %7 = vector.load %arg2[%c0_6, %c0_7] : memref<128x128xbf16, #tpu.memory_space<vmem>>, vector<128x128xbf16>
    %cst = arith.constant dense<0.000000e+00> : vector<16x128xf32>
    %8 = tpu.matmul %6, %7, %cst {dimension_numbers = #tpu.dot_dimension_numbers<[1], [0], [0], [1], [0, 0, 1, 1], [], []>} : vector<16x128xbf16>, vector<128x128xbf16>, vector<16x128xf32> -> vector<16x128xf32>
    %c0_8 = arith.constant 0 : index
    %c0_9 = arith.constant 0 : index
    %9 = vector.load %arg3[%c0_8, %c0_9] : memref<1x128xf32, #tpu.memory_space<vmem>>, vector<1x128xf32>
    %10 = vector.broadcast %9 : vector<1x128xf32> to vector<16x128xf32>
    %11 = arith.addf %8, %10 : vector<16x128xf32>
    %cst_10 = arith.constant 0.000000e+00 : f32
    %12 = vector.broadcast %cst_10 : f32 to vector<16x128xf32>
    %13 = arith.maximumf %11, %12 : vector<16x128xf32>
    %14 = arith.truncf %13 : vector<16x128xf32> to vector<16x128xbf16>
    %c0_11 = arith.constant 0 : index
    %c0_12 = arith.constant 0 : index
    %15 = vector.load %arg4[%c0_11, %c0_12] : memref<128x128xbf16, #tpu.memory_space<vmem>>, vector<128x128xbf16>
    %cst_13 = arith.constant dense<0.000000e+00> : vector<16x128xf32>
    %16 = tpu.matmul %14, %15, %cst_13 {dimension_numbers = #tpu.dot_dimension_numbers<[1], [0], [0], [1], [0, 0, 1, 1], [], []>} : vector<16x128xbf16>, vector<128x128xbf16>, vector<16x128xf32> -> vector<16x128xf32>
    %c0_14 = arith.constant 0 : index
    %c0_15 = arith.constant 0 : index
    %17 = vector.load %arg5[%c0_14, %c0_15] : memref<1x128xf32, #tpu.memory_space<vmem>>, vector<1x128xf32>
    %18 = vector.broadcast %17 : vector<1x128xf32> to vector<16x128xf32>
    %19 = arith.addf %16, %18 : vector<16x128xf32>
    %cst_16 = arith.constant 0.000000e+00 : f32
    %20 = vector.broadcast %cst_16 : f32 to vector<16x128xf32>
    %21 = arith.maximumf %19, %20 : vector<16x128xf32>
    %22 = arith.truncf %21 : vector<16x128xf32> to vector<16x128xbf16>
    %c0_17 = arith.constant 0 : index
    %c0_18 = arith.constant 0 : index
    %23 = vector.load %arg6[%c0_17, %c0_18] : memref<128x128xbf16, #tpu.memory_space<vmem>>, vector<128x128xbf16>
    %cst_19 = arith.constant dense<0.000000e+00> : vector<16x128xf32>
    %24 = tpu.matmul %22, %23, %cst_19 {dimension_numbers = #tpu.dot_dimension_numbers<[1], [0], [0], [1], [0, 0, 1, 1], [], []>} : vector<16x128xbf16>, vector<128x128xbf16>, vector<16x128xf32> -> vector<16x128xf32>
    %c0_20 = arith.constant 0 : index
    %c0_21 = arith.constant 0 : index
    %25 = vector.load %arg7[%c0_20, %c0_21] : memref<1x128xf32, #tpu.memory_space<vmem>>, vector<1x128xf32>
    %26 = vector.broadcast %25 : vector<1x128xf32> to vector<16x128xf32>
    %27 = arith.addf %24, %26 : vector<16x128xf32>
    %cst_22 = arith.constant 0.000000e+00 : f32
    %28 = vector.broadcast %cst_22 : f32 to vector<16x128xf32>
    %29 = arith.maximumf %27, %28 : vector<16x128xf32>
    %30 = arith.truncf %29 : vector<16x128xf32> to vector<16x128xbf16>
    %c0_23 = arith.constant 0 : index
    %c0_24 = arith.constant 0 : index
    %31 = vector.load %arg8[%c0_23, %c0_24] : memref<128x128xbf16, #tpu.memory_space<vmem>>, vector<128x128xbf16>
    %cst_25 = arith.constant dense<0.000000e+00> : vector<16x128xf32>
    %32 = tpu.matmul %30, %31, %cst_25 {dimension_numbers = #tpu.dot_dimension_numbers<[1], [0], [0], [1], [0, 0, 1, 1], [], []>} : vector<16x128xbf16>, vector<128x128xbf16>, vector<16x128xf32> -> vector<16x128xf32>
    %c0_26 = arith.constant 0 : index
    %c0_27 = arith.constant 0 : index
    %33 = vector.load %arg9[%c0_26, %c0_27] : memref<1x128xf32, #tpu.memory_space<vmem>>, vector<1x128xf32>
    %34 = vector.broadcast %33 : vector<1x128xf32> to vector<16x128xf32>
    %35 = arith.addf %32, %34 : vector<16x128xf32>
    %36 = arith.truncf %35 : vector<16x128xf32> to vector<16x128xbf16>
    %c0_28 = arith.constant 0 : index
    %c0_29 = arith.constant 0 : index
    %37 = vector.load %arg10[%c0_28, %c0_29] : memref<16x128xbf16, #tpu.memory_space<vmem>>, vector<16x128xbf16>
    tpu.vector_store %arg10[%c0_28, %c0_29], %36 {strides = array<i32>} : memref<16x128xbf16, #tpu.memory_space<vmem>>, vector<16x128xbf16>,
    return
  }
  func.func @transform_0(%arg0: i32) -> (i32, i32) {
    %c0_i32 = arith.constant 0 : i32
    %c0_i32_0 = arith.constant 0 : i32
    return %arg0, %c0_i32 : i32, i32
  }
  func.func @transform_1(%arg0: i32) -> (i32, i32) {
    %c0_i32 = arith.constant 0 : i32
    %c0_i32_0 = arith.constant 0 : i32
    %c0_i32_1 = arith.constant 0 : i32
    return %c0_i32, %c0_i32_0 : i32, i32
  }
  func.func @transform_2(%arg0: i32) -> (i32, i32) {
    %c0_i32 = arith.constant 0 : i32
    %c0_i32_0 = arith.constant 0 : i32
    %c0_i32_1 = arith.constant 0 : i32
    return %c0_i32, %c0_i32_0 : i32, i32
  }
  func.func @transform_3(%arg0: i32) -> (i32, i32) {
    %c0_i32 = arith.constant 0 : i32
    %c0_i32_0 = arith.constant 0 : i32
    %c0_i32_1 = arith.constant 0 : i32
    return %c0_i32, %c0_i32_0 : i32, i32
  }
  func.func @transform_4(%arg0: i32) -> (i32, i32) {
    %c0_i32 = arith.constant 0 : i32
    %c0_i32_0 = arith.constant 0 : i32
    %c0_i32_1 = arith.constant 0 : i32
    return %c0_i32, %c0_i32_0 : i32, i32
  }
  func.func @transform_5(%arg0: i32) -> (i32, i32) {
    %c0_i32 = arith.constant 0 : i32
    %c0_i32_0 = arith.constant 0 : i32
    %c0_i32_1 = arith.constant 0 : i32
    return %c0_i32, %c0_i32_0 : i32, i32
  }
  func.func @transform_6(%arg0: i32) -> (i32, i32) {
    %c0_i32 = arith.constant 0 : i32
    %c0_i32_0 = arith.constant 0 : i32
    %c0_i32_1 = arith.constant 0 : i32
    return %c0_i32, %c0_i32_0 : i32, i32
  }
  func.func @transform_7(%arg0: i32) -> (i32, i32) {
    %c0_i32 = arith.constant 0 : i32
    %c0_i32_0 = arith.constant 0 : i32
    %c0_i32_1 = arith.constant 0 : i32
    return %c0_i32, %c0_i32_0 : i32, i32
  }
  func.func @transform_8(%arg0: i32) -> (i32, i32) {
    %c0_i32 = arith.constant 0 : i32
    %c0_i32_0 = arith.constant 0 : i32
    %c0_i32_1 = arith.constant 0 : i32
    return %c0_i32, %c0_i32_0 : i32, i32
  }
  func.func @transform_9(%arg0: i32) -> (i32, i32) {
    %c0_i32 = arith.constant 0 : i32
    %c0_i32_0 = arith.constant 0 : i32
    return %arg0, %c0_i32 : i32, i32
  }
}

</mosaic_0001>

<bundles_post_ra>
// kernel: mlp_forward.1
= control target key start
LH: loop header
LB: loop body
LE: loop exit
PB: predicated region body
PF: predicated region fallthrough
CT: control target
= control target key end

     0   :  { %14 = vsyncpa [#allocation4], 0  ;;  %s838_s0 = inlined_call_operand.vmem [shape: f32[16,16], index: 0, kind: input, shape index: {}]   ;;  %s839_s1 = inlined_call_operand.hbm [shape: bf16[128,128], index: 1, kind: input, shape index: {}]   ;;  %s840_s2 = inlined_call_operand.vmem [shape: f32[1,128], index: 2, kind: input, shape index: {}]   ;;  %s841_s3 = inlined_call_operand.hbm [shape: bf16[128,128], index: 3, kind: input, shape index: {}]   ;;  %s842_s4 = inlined_call_operand.vmem [shape: f32[1,128], index: 4, kind: input, shape index: {}]   ;;  %s843_s5 = inlined_call_operand.hbm [shape: bf16[128,128], index: 5, kind: input, shape index: {}]   ;;  %s844_s6 = inlined_call_operand.vmem [shape: f32[1,128], index: 6, kind: input, shape index: {}]   ;;  %s845_s7 = inlined_call_operand.hbm [shape: bf16[128,128], index: 7, kind: input, shape index: {}]   ;;  %s846_s8 = inlined_call_operand.vmem [shape: f32[1,128], index: 8, kind: input, shape index: {}]   ;;  %s847_s9 = inlined_call_operand.vmem [shape: bf16[16,128], index: 9, kind: output, shape index: {}]  }
   0x1   :  { %15 = vsyncpa [#allocation6], 0 }
   0x2   :  { %16 = vsyncpa [#allocation9], 0  ;;  %s38_s11 = sshll.u32 %s841_s3, 4  ;;  %s748_s12 = smov [#allocation5]   ;;  %s39_s11 = int_to_ptr.hbm [resolvable:$true] %s38_s11 }
   0x3   :  { %s40_s13 = sshll.u32 %s748_s12, 4  ;;  %s23_s16 = sshll.u32 %s839_s1, 4  ;;  %s41_s13 = int_to_ptr.vmem [resolvable:$true] %s40_s13  ;;  %s24_s16 = int_to_ptr.hbm [resolvable:$true] %s23_s16 }
   0x4   :  { %s749_s17 = smov 64   ;;  %s750_s18 = smov 4  }
   0x5   :  { %46 = dma.hbm_to_vmem [thread:$0]  %s39_s11, 1024, %s41_s13, [#allocation6], %s749_s17, %s749_s17, %s750_s18  }
   0x6   :  { %s751_s19 = smov [#allocation3]   ;;  %s53_s23 = sshll.u32 %s843_s5, 4  ;;  %s54_s23 = int_to_ptr.hbm [resolvable:$true] %s53_s23 }
   0x7   :  { %s25_s20 = sshll.u32 %s751_s19, 4  ;;  %s68_s25 = sshll.u32 %s845_s7, 4  ;;  %s26_s20 = int_to_ptr.vmem [resolvable:$true] %s25_s20  ;;  %s69_s25 = int_to_ptr.hbm [resolvable:$true] %s68_s25 }
   0x8   :  { %31 = dma.hbm_to_vmem [thread:$0]  %s24_s16, 1024, %s26_s20, [#allocation4], %s749_s17, %s749_s17, %s750_s18  }
   0x9   :  { %s752_s26 = smov [#allocation7]   ;;  %s753_s1 = smov [#allocation8]  }
   0xa   :  { %s55_s27 = sshll.u32 %s752_s26, 4  ;;  %s70_s28 = sshll.u32 %s753_s1, 4  ;;  %s56_s27 = int_to_ptr.vmem [resolvable:$true] %s55_s27  ;;  %s71_s28 = int_to_ptr.vmem [resolvable:$true] %s70_s28 }
   0xb   :  { %61 = dma.hbm_to_vmem [thread:$0]  %s54_s23, 1024, %s56_s27, [#allocation6], %s749_s17, %s749_s17, %s750_s18  }
   0xc   :  { %76 = dma.hbm_to_vmem [thread:$0]  %s69_s25, 1024, %s71_s28, [#allocation9], %s749_s17, %s749_s17, %s750_s18  }
   0xd   :  { %742 = dma.done.wait [#allocation4], 1024  }
   0xe   :  { %743 = vsyncadd [#allocation4], 4294966272 }
   0xf   :  { %744 = dma.done.wait [#allocation6], 2048  }
  0x10   :  { %745 = vsyncadd [#allocation6], 4294965248 }
  0x11   :  { %746 = dma.done.wait [#allocation9], 1024  }
  0x12   :  { %747 = vsyncadd [#allocation9], 4294966272  ;;  %v754_v0 = vmov 0   ;;  %v605_v1 = vld [vmem:[#allocation3 + $0x38] sm:$0xff]  ;;  %v604_v2 = vld [vmem:[#allocation3 + $0x30] sm:$0xff]  ;;  %vm106_vm0 = vcmask 125952  }
  0x13   :  { %100 = vst [vmem:[#allocation2] sm:$0xf] %v754_v0  ;;  %185 = vmatpush.bf16.msra.mxu0 %v605_v1  ;;  %v102_v3 = vld [vmem:[%s838_s0] sm:$0xff]  ;;  %v103_v4 = vld [vmem:[%s838_s0 + $0x8] sm:$0xff]  ;;  %v603_v8 = vld [vmem:[#allocation3 + $0x28] sm:$0xff] }
  0x14   :  { %101 = vst [vmem:[#allocation2 + $0x4] sm:$0xf] %v754_v0  ;;  %v104_v5 = vpack.c.bf16 %v102_v3, %v102_v3  ;;  %v613_v6 = vld [vmem:[#allocation5 + $0x38] sm:$0xff]  ;;  %v105_v7 = vpack.c.bf16 %v103_v4, %v103_v4  ;;  %v612_v9 = vld [vmem:[#allocation5 + $0x30] sm:$0xff]  ;;  %v611_v10 = vld [vmem:[#allocation5 + $0x28] sm:$0xff] }
  0x15   :  { %270 = vmatpush.bf16.msra.mxu1 %v613_v6  ;;  %v602_v11 = vld [vmem:[#allocation3 + $0x20] sm:$0xff]  ;;  %v601_v13 = vld [vmem:[#allocation3 + $0x18] sm:$0xff]  ;;  %v600_v14 = vld [vmem:[#allocation3 + $0x10] sm:$0xff] }
  0x16   :  { %107 = vst.msk [vmem:[#allocation2] sm:$0xf] %vm106_vm0, %v104_v5  ;;  %v610_v12 = vld [vmem:[#allocation5 + $0x20] sm:$0xff]  ;;  %v599_v15 = vld [vmem:[#allocation3 + $0x8] sm:$0xff]  ;;  %v609_v18 = vld [vmem:[#allocation5 + $0x18] sm:$0xff] }
  0x17   :  { %186 = vmatpush.bf16.msra.mxu0 %v604_v2  ;;  %108 = vst.msk [vmem:[#allocation2 + $0x4] sm:$0xf] %vm106_vm0, %v105_v7  ;;  %v598_v16 = vld [vmem:[#allocation3] sm:$0xff]  ;;  %v608_v19 = vld [vmem:[#allocation5 + $0x10] sm:$0xff]  ;;  %v607_v20 = vld [vmem:[#allocation5 + $0x8] sm:$0xff] }
  0x18   :  { %v606_v21 = vld [vmem:[#allocation5] sm:$0xff]  ;;  %v621_v22 = vld [vmem:[#allocation7 + $0x38] sm:$0xff]  ;;  %v620_v23 = vld [vmem:[#allocation7 + $0x30] sm:$0xff] }
  0x19   :  { %271 = vmatpush.bf16.msra.mxu1 %v612_v9  ;;  %355 = vmatpush.bf16.msra.mxu2 %v621_v22  ;;  %v619_v24 = vld [vmem:[#allocation7 + $0x28] sm:$0xff]  ;;  %v618_v25 = vld [vmem:[#allocation7 + $0x20] sm:$0xff]  ;;  %v642_v27 = vld [vmem:[%s840_s2] ss:$0 sm:$0xff] }
  0x1a   :  { %v617_v34 = vld [vmem:[#allocation7 + $0x18] sm:$0xff]  ;;  %v616_v35 = vld [vmem:[#allocation7 + $0x10] sm:$0xff]  ;;  %v615_v36 = vld [vmem:[#allocation7 + $0x8] sm:$0xff] }
  0x1b   :  { %187 = vmatpush.bf16.msra.mxu0 %v603_v8  ;;  %v614_v37 = vld [vmem:[#allocation7] sm:$0xff]  ;;  %v629_v38 = vld [vmem:[#allocation8 + $0x38] sm:$0xff]  ;;  %v628_v39 = vld [vmem:[#allocation8 + $0x30] sm:$0xff] }
  0x1c   :  { %440 = vmatpush.bf16.msra.mxu3 %v629_v38  ;;  %v627_v40 = vld [vmem:[#allocation8 + $0x28] sm:$0xff]  ;;  %v626_v41 = vld [vmem:[#allocation8 + $0x20] sm:$0xff]  ;;  %v643_v43 = vld [vmem:[%s842_s4] ss:$0 sm:$0xff] }
  0x1d   :  { %272 = vmatpush.bf16.msra.mxu1 %v611_v10  ;;  %356 = vmatpush.bf16.msra.mxu2 %v620_v23  ;;  %v625_v50 = vld [vmem:[#allocation8 + $0x18] sm:$0xff]  ;;  %v624_v51 = vld [vmem:[#allocation8 + $0x10] sm:$0xff]  ;;  %v623_v52 = vld [vmem:[#allocation8 + $0x8] sm:$0xff] }
  0x1e   :  { %v597_v17 = vld [vmem:[#allocation2] sm:$0xff]  ;;  %v622_v53 = vld [vmem:[#allocation8] sm:$0xff] }
  0x1f   :  { %188 = vmatpush.bf16.msra.mxu0 %v602_v11  ;;  %v644_v55 = vld [vmem:[%s844_s6] ss:$0 sm:$0xff] }
  0x20   :  { %441 = vmatpush.bf16.msra.mxu3 %v628_v39  ;;  %v645_v63 = vld [vmem:[%s846_s8] ss:$0 sm:$0xff] }
  0x21   :  { %273 = vmatpush.bf16.msra.mxu1 %v610_v12  ;;  %357 = vmatpush.bf16.msra.mxu2 %v619_v24 }
  0x23   :  { %189 = vmatpush.bf16.msra.mxu0 %v601_v13 }
  0x24   :  { %442 = vmatpush.bf16.msra.mxu3 %v627_v40 }
  0x25   :  { %274 = vmatpush.bf16.msra.mxu1 %v609_v18  ;;  %358 = vmatpush.bf16.msra.mxu2 %v618_v25 }
  0x27   :  { %190 = vmatpush.bf16.msra.mxu0 %v600_v14 }
  0x28   :  { %443 = vmatpush.bf16.msra.mxu3 %v626_v41 }
  0x29   :  { %275 = vmatpush.bf16.msra.mxu1 %v608_v19  ;;  %359 = vmatpush.bf16.msra.mxu2 %v617_v34 }
  0x2b   :  { %191 = vmatpush.bf16.msra.mxu0 %v599_v15 }
  0x2c   :  { %444 = vmatpush.bf16.msra.mxu3 %v625_v50 }
  0x2d   :  { %276 = vmatpush.bf16.msra.mxu1 %v607_v20  ;;  %360 = vmatpush.bf16.msra.mxu2 %v616_v35 }
  0x2f   :  { %192 = vmatpush.bf16.msra.mxu0 %v598_v16 }
  0x30   :  { %445 = vmatpush.bf16.msra.mxu3 %v624_v51 }
  0x31   :  { %277 = vmatpush.bf16.msra.mxu1 %v606_v21  ;;  %361 = vmatpush.bf16.msra.mxu2 %v615_v36 }
  0x32   :  { %193 = vmatmul.bf16.vlgmr.msra.gmra.mxu0 %v597_v17 }
  0x34   :  { %446 = vmatpush.bf16.msra.mxu3 %v623_v52 }
  0x35   :  { %362 = vmatpush.bf16.msra.mxu2 %v614_v37 }
  0x38   :  { %447 = vmatpush.bf16.msra.mxu3 %v622_v53 }
  0xaf   :  { %v194_v26 = vpop.f32.mrf.mxu0 }
  0xb0   :  { %v195_v28 = vadd.f32 %v642_v27, %v194_v26 }
  0xb2   :  { %v199_v31 = vmax.f32 %v195_v28, 0.0 }
  0xb7   :  { %v196_v29 = vpop.f32.mrf.mxu0 }
  0xb8   :  { %v197_v30 = vadd.f32 %v642_v27, %v196_v29 }
  0xba   :  { %v200_v32 = vmax.f32 %v197_v30, 0.0 }
  0xbc   :  { %v201_v33 = vpack.c.bf16 %v200_v32, %v199_v31 }
  0xbe   :  { %278 = vmatmul.bf16.vlgmr.msra.gmra.mxu1 %v201_v33 }
 0x13b   :  { %v279_v42 = vpop.f32.mrf.mxu1 }
 0x13c   :  { %v280_v44 = vadd.f32 %v643_v43, %v279_v42 }
 0x13e   :  { %v284_v47 = vmax.f32 %v280_v44, 0.0 }
 0x143   :  { %v281_v45 = vpop.f32.mrf.mxu1 }
 0x144   :  { %v282_v46 = vadd.f32 %v643_v43, %v281_v45 }
 0x146   :  { %v285_v48 = vmax.f32 %v282_v46, 0.0 }
 0x148   :  { %v286_v49 = vpack.c.bf16 %v285_v48, %v284_v47 }
 0x14a   :  { %363 = vmatmul.bf16.vlgmr.msra.gmra.mxu2 %v286_v49 }
 0x1cd   :  { %v364_v54 = vpop.f32.mrf.mxu2 }
 0x1ce   :  { %v365_v56 = vadd.f32 %v644_v55, %v364_v54 }
 0x1d0   :  { %v369_v59 = vmax.f32 %v365_v56, 0.0 }
 0x1d5   :  { %v366_v57 = vpop.f32.mrf.mxu2 }
 0x1d6   :  { %v367_v58 = vadd.f32 %v644_v55, %v366_v57 }
 0x1d8   :  { %v370_v60 = vmax.f32 %v367_v58, 0.0 }
 0x1da   :  { %v371_v61 = vpack.c.bf16 %v370_v60, %v369_v59 }
 0x1dc   :  { %448 = vmatmul.bf16.vlgmr.msra.gmra.mxu3 %v371_v61 }
 0x25f   :  { %v449_v62 = vpop.f32.mrf.mxu3 }
 0x260   :  { %v450_v1 = vadd.f32 %v645_v63, %v449_v62 }
 0x267   :  { %v451_v0 = vpop.f32.mrf.mxu3 }
 0x268   :  { %v452_v2 = vadd.f32 %v645_v63, %v451_v0 }
 0x26a   :  { %v633_v3 = vpack.c.bf16 %v452_v2, %v450_v1 }
 0x26c   :  { %634 = vst [vmem:[%s847_s9] sm:$0xff] %v633_v3  }
 0x26d   :  { %462 = vsyncpa [#allocation4], 1 }
 0x26e   :  { %463 = vsyncpa [#allocation6], 1 }
 0x26f   :  { %464 = vsyncpa [#allocation9], 1 }

</bundles_post_ra>
